<compile_context>
chip_gen: v7x
topology: tpu7x:2x2x1
jax: 0.10.0
libtpu: 0.0.40
codegen_flags: <defaults>
</compile_context>

<pallas_src>
import math
import functools

import jax
import jax.numpy as jnp
from jax.experimental import pallas as pl
from jax.experimental.pallas import tpu as pltpu


_SQRT_HALF = 1.0 / math.sqrt(2.0)
_TANH_C0 = math.sqrt(2.0 / math.pi)
_TANH_C1 = 0.044715

# Cast matmul inputs to bf16 (f32 accumulation) for MXU throughput at scale.
# Off by default so results match torch.nn.Linear/GELU f32 numerics to 1e-5.
USE_BF16_MATMUL = False
# tanh-approx GELU executes on the EUP (its own VLIW slot) instead of the VALU
# erf polynomial.  Off by default: breaks exact-torch 1e-5 parity.
GELU_APPROXIMATE = False


def _gelu(y):
    if GELU_APPROXIMATE:
        return 0.5 * y * (1.0 + jnp.tanh(_TANH_C0 * (y + _TANH_C1 * y * y * y)))
    # Exact (erf-based) GELU -- matches torch.nn.GELU() default.
    return 0.5 * y * (1.0 + jax.lax.erf(y * _SQRT_HALF))


# ------------------------- Fused Pallas kernel --------------------------------

def _fused_block_kernel(n_enc, x_ref, *refs):
    """Whole LinearSkipBlock (encode + decode) for one row-tile.

    refs = (w0, b0, w1, b1, ..., w_{L-1}, b_{L-1}, o_ref) with L = 2*n_enc.
    Weights are pre-transposed to [Din, Dout] (and pre-cast if bf16 mode);
    biases are [1, Dout].  Intermediates / skip tensors never leave VMEM/vregs.
    """
    o_ref = refs[-1]
    wb = refs[:-1]

    def layer(h, idx):
        w = wb[2 * idx][...]                              # already bf16 if enabled
        b = wb[2 * idx + 1][...].astype(jnp.float32)
        lhs = h.astype(w.dtype) if w.dtype != h.dtype else h
        y = jnp.dot(lhs, w, preferred_element_type=jnp.float32)
        return _gelu(y + b)                               # bias/GELU stay f32 (v5e-safe)

    h = x_ref[...].astype(jnp.float32)

    # TODO(synk): if n_enc / row tile grow, stage `acts` in explicit pltpu.VMEM
    # scratch so spills are planned instead of regalloc-driven.
    acts = []
    for i in range(n_enc):                      # encode
        acts.append(h)
        h = layer(h, i)
    for j in range(n_enc):                      # decode + skip
        h = layer(h, n_enc + j) + acts[n_enc - 1 - j]

    o_ref[...] = h.astype(o_ref.dtype)


# ------------------------- Wrapper --------------------------------------------

def _round_up(v, m):
    return (v + m - 1) // m * m


def _pick_row_tile(n, d0, live_feat_dims, io_itemsize, weight_bytes,
                   max_rows_per_tile, vmem_budget_bytes):
    """Rows per tile, derived from a VMEM budget (v7x-safe: ~half of v6e)."""
    # Per-row VMEM footprint: x + out tiles (double buffered, I/O dtype) plus
    # live f32 activations / skip tensors inside the body.
    per_row = 2 * 2 * d0 * io_itemsize + 4 * live_feat_dims
    budget = max(vmem_budget_bytes - 2 * weight_bytes, 64 * per_row)
    tm = int(budget // per_row)
    tm = min(tm, max_rows_per_tile, _round_up(n, 8))
    tm = max(8, (tm // 8) * 8)                  # sublane multiple
    # Keep >= 2 grid steps when possible so the 2nd TensorCore (v7x megacore)
    # and the software pipeline are never idle.
    if n > 8 and -(-n // tm) < 2:
        tm = max(8, _round_up(-(-n // 2), 8))
    return tm


def linear_skip_block_forward(params, x, *, max_rows_per_tile=8192,
                              vmem_budget_bytes=20 * 1024 * 1024):
    """Forward pass of LinearSkipBlock (eval mode: dropout == identity)."""
    lead_shape = x.shape[:-1]
    d0 = x.shape[-1]
    n = 1
    for d in lead_shape:
        n *= d
    x2d = x.reshape(n, d0)

    n_enc = len(params["encode"])
    layers = list(params["encode"]) + list(params["decode"])
    if USE_BF16_MATMUL:
        # Pre-cast once in the wrapper: halves weight VMEM/HBM bytes and avoids
        # per-grid-step VALU converts inside the kernel.
        layers = [(w.astype(jnp.bfloat16), b) for (w, b) in layers]

    io_itemsize = jnp.dtype(x.dtype).itemsize
    weight_bytes = sum(
        int(w.size) * jnp.dtype(w.dtype).itemsize
        + int(b.size) * jnp.dtype(b.dtype).itemsize
        for w, b in layers)
    # Feature widths live across the body: input + encode skips + all layer outputs.
    live_feat = (d0 + sum(int(w.shape[0]) for w, _ in layers[:n_enc])
                 + sum(int(w.shape[1]) for w, _ in layers))

    tm = _pick_row_tile(n, d0, live_feat, io_itemsize, weight_bytes,
                        max_rows_per_tile, vmem_budget_bytes)
    grid = (pl.cdiv(n, tm),)   # ragged last block handled by Pallas masking

    est_vmem = (2 * 2 * tm * d0 * io_itemsize + 4 * tm * live_feat
                + 2 * weight_bytes)
    vmem_limit = int(min(64 * 1024 * 1024,
                         max(2 * est_vmem, 16 * 1024 * 1024)))

    # Advisory cost estimate (accurate dtypes, unpadded rows, erf != transcendental).
    flops = 2 * n * sum(int(w.shape[0]) * int(w.shape[1]) for w, _ in layers)
    gelu_elems = n * sum(int(w.shape[1]) for w, _ in layers)
    transcendentals = gelu_elems if GELU_APPROXIMATE else 0
    bytes_accessed = 2 * n * d0 * io_itemsize + weight_bytes

    def _wspec(shape, single_buffer):
        if single_buffer:
            # Grid-invariant block: one VMEM buffer is enough.
            return pl.BlockSpec(shape, lambda i: (0, 0),
                                pipeline_mode=pl.Buffered(1))
        return pl.BlockSpec(shape, lambda i: (0, 0))

    def _run(single_buffer_weights):
        in_specs = [pl.BlockSpec((tm, d0), lambda i: (i, 0))]
        args = [x2d]
        for (w_t, b_row) in layers:
            in_specs.append(_wspec(w_t.shape, single_buffer_weights))
            in_specs.append(_wspec(b_row.shape, single_buffer_weights))
            args.append(w_t)
            args.append(b_row)
        return pl.pallas_call(
            functools.partial(_fused_block_kernel, n_enc),
            out_shape=jax.ShapeDtypeStruct((n, d0), x.dtype),
            grid=grid,
            in_specs=in_specs,
            out_specs=pl.BlockSpec((tm, d0), lambda i: (i, 0)),
            compiler_params=pltpu.CompilerParams(
                dimension_semantics=("parallel",),
                vmem_limit_bytes=vmem_limit),
            cost_estimate=pl.CostEstimate(
                flops=flops,
                transcendentals=transcendentals,
                bytes_accessed=bytes_accessed),
        )(*args)

    try:
        out = _run(single_buffer_weights=True)
    except Exception:
        # pipeline_mode=Buffered(1) unsupported on this jax/backend version:
        # fall back to default double-buffered weight blocks (VMEM cost is tiny
        # at these dims, so correctness > the small VMEM saving).
        out = _run(single_buffer_weights=False)

    return out.reshape(*lead_shape, d0)


# ------------------------- Params (pre-transposed at init) --------------------

def init_linear_skip_block_params(key, dims):
    """Params mirroring nn.Linear default init (U(-1/sqrt(fan_in), +..)).

    Stored pre-transposed: each layer is (w_t[Din, Dout], b[1, Dout]).
    """
    params = {"encode": [], "decode": []}

    def make(key, fan_in, fan_out):
        key, kw, kb = jax.random.split(key, 3)
        bound = 1.0 / math.sqrt(fan_in)
        w = jax.random.uniform(kw, (fan_out, fan_in), jnp.float32, -bound, bound)
        b = jax.random.uniform(kb, (fan_out,), jnp.float32, -bound, bound)
        return key, (w.T, b.reshape(1, -1))

    for i in range(len(dims) - 1):                       # encode: dims[i] -> dims[i+1]
        key, wb = make(key, dims[i], dims[i + 1])
        params["encode"].append(wb)
    for i in range(len(dims) - 1, 0, -1):                # decode: dims[i] -> dims[i-1]
        key, wb = make(key, dims[i], dims[i - 1])
        params["decode"].append(wb)
    return params


# ------------------------- Pure-JAX reference ----------------------------------

def _reference_forward(params, x):
    def lin_gelu(x2, w_t, b_row):
        return jax.nn.gelu(x2 @ w_t + b_row.reshape(-1),
                           approximate=GELU_APPROXIMATE)

    lead = x.shape[:-1]
    x2 = x.reshape(-1, x.shape[-1])
    acts = []
    for (w_t, b) in params["encode"]:
        acts.append(x2)
        x2 = lin_gelu(x2, w_t, b)
    for (w_t, b), a in zip(params["decode"], acts[::-1]):
        x2 = lin_gelu(x2, w_t, b) + a
    return x2.reshape(*lead, x2.shape[-1])


# ------------------------- Main -------------------------------------------------

if __name__ == "__main__":
    key = jax.random.PRNGKey(0)
    k_param, k_x = jax.random.split(key)

    dims = [32, 16, 8]   # -> 2 encode layers + 2 decode layers
    dropout_p = 0.1      # unused at eval time (identity)
    B, T = 2, 8          # x: [batch, seq, features]

    params = init_linear_skip_block_params(k_param, dims)
    x = jax.random.normal(k_x, (B, T, dims[0]), dtype=jnp.float32)

    out = linear_skip_block_forward(params, x)
    out = jax.block_until_ready(out)

    ref = _reference_forward(params, x)
    assert out.shape == (B, T, dims[0]), out.shape
    assert jnp.allclose(out, ref, atol=1e-5, rtol=1e-5), "mismatch vs reference"

    print("KERNEL_OK")
</pallas_src>

<mosaic_0001>
module attributes {stable_mosaic.version = 11 : i64} {
  func.func @_fused_block_kernel(%arg0: i32, %arg1: memref<8x32xf32, #tpu.memory_space<vmem>>, %arg2: memref<32x16xf32, #tpu.memory_space<vmem>>, %arg3: memref<1x16xf32, #tpu.memory_space<vmem>>, %arg4: memref<16x8xf32, #tpu.memory_space<vmem>>, %arg5: memref<1x8xf32, #tpu.memory_space<vmem>>, %arg6: memref<8x16xf32, #tpu.memory_space<vmem>>, %arg7: memref<1x16xf32, #tpu.memory_space<vmem>>, %arg8: memref<16x32xf32, #tpu.memory_space<vmem>>, %arg9: memref<1x32xf32, #tpu.memory_space<vmem>>, %arg10: memref<8x32xf32, #tpu.memory_space<vmem>>) attributes {dimension_semantics = [#tpu.dimension_semantics<parallel>], iteration_bounds = array<i64: 2>, scalar_prefetch = 0 : i64, scratch_operands = 0 : i64, tpu.core_type = #tpu.core_type<tc>, window_params = [{transform_indices = @transform_0, window_bounds = array<i64: 8, 32>}, {pipeline_mode = #tpu.pipeline_mode<synchronous>, transform_indices = @transform_1, window_bounds = array<i64: 32, 16>}, {pipeline_mode = #tpu.pipeline_mode<synchronous>, transform_indices = @transform_2, window_bounds = array<i64: 1, 16>}, {pipeline_mode = #tpu.pipeline_mode<synchronous>, transform_indices = @transform_3, window_bounds = array<i64: 16, 8>}, {pipeline_mode = #tpu.pipeline_mode<synchronous>, transform_indices = @transform_4, window_bounds = array<i64: 1, 8>}, {pipeline_mode = #tpu.pipeline_mode<synchronous>, transform_indices = @transform_5, window_bounds = array<i64: 8, 16>}, {pipeline_mode = #tpu.pipeline_mode<synchronous>, transform_indices = @transform_6, window_bounds = array<i64: 1, 16>}, {pipeline_mode = #tpu.pipeline_mode<synchronous>, transform_indices = @transform_7, window_bounds = array<i64: 16, 32>}, {pipeline_mode = #tpu.pipeline_mode<synchronous>, transform_indices = @transform_8, window_bounds = array<i64: 1, 32>}, {transform_indices = @transform_9, window_bounds = array<i64: 8, 32>}]} {
    %c0 = arith.constant 0 : index
    %c0_0 = arith.constant 0 : index
    %0 = vector.load %arg1[%c0, %c0_0] : memref<8x32xf32, #tpu.memory_space<vmem>>, vector<8x32xf32>
    %c0_1 = arith.constant 0 : index
    %c0_2 = arith.constant 0 : index
    %1 = vector.load %arg2[%c0_1, %c0_2] : memref<32x16xf32, #tpu.memory_space<vmem>>, vector<32x16xf32>
    %c0_3 = arith.constant 0 : index
    %c0_4 = arith.constant 0 : index
    %2 = vector.load %arg3[%c0_3, %c0_4] : memref<1x16xf32, #tpu.memory_space<vmem>>, vector<1x16xf32>
    %cst = arith.constant dense<0.000000e+00> : vector<8x16xf32>
    %3 = tpu.matmul %0, %1, %cst {dimension_numbers = #tpu.dot_dimension_numbers<[1], [0], [0], [1], [0, 0, 1, 1], [], []>} : vector<8x32xf32>, vector<32x16xf32>, vector<8x16xf32> -> vector<8x16xf32>
    %4 = vector.broadcast %2 : vector<1x16xf32> to vector<8x16xf32>
    %5 = arith.addf %3, %4 : vector<8x16xf32>
    %cst_5 = arith.constant 5.000000e-01 : f32
    %6 = vector.broadcast %cst_5 : f32 to vector<8x16xf32>
    %7 = arith.mulf %6, %5 : vector<8x16xf32>
    %cst_6 = arith.constant 0.707106769 : f32
    %8 = vector.broadcast %cst_6 : f32 to vector<8x16xf32>
    %9 = arith.mulf %5, %8 : vector<8x16xf32>
    %10 = math.erf %9 : vector<8x16xf32>
    %cst_7 = arith.constant 1.000000e+00 : f32
    %11 = vector.broadcast %cst_7 : f32 to vector<8x16xf32>
    %12 = arith.addf %11, %10 : vector<8x16xf32>
    %13 = arith.mulf %7, %12 : vector<8x16xf32>
    %c0_8 = arith.constant 0 : index
    %c0_9 = arith.constant 0 : index
    %14 = vector.load %arg4[%c0_8, %c0_9] : memref<16x8xf32, #tpu.memory_space<vmem>>, vector<16x8xf32>
    %c0_10 = arith.constant 0 : index
    %c0_11 = arith.constant 0 : index
    %15 = vector.load %arg5[%c0_10, %c0_11] : memref<1x8xf32, #tpu.memory_space<vmem>>, vector<1x8xf32>
    %cst_12 = arith.constant dense<0.000000e+00> : vector<8x8xf32>
    %16 = tpu.matmul %13, %14, %cst_12 {dimension_numbers = #tpu.dot_dimension_numbers<[1], [0], [0], [1], [0, 0, 1, 1], [], []>} : vector<8x16xf32>, vector<16x8xf32>, vector<8x8xf32> -> vector<8x8xf32>
    %17 = vector.broadcast %15 : vector<1x8xf32> to vector<8x8xf32>
    %18 = arith.addf %16, %17 : vector<8x8xf32>
    %cst_13 = arith.constant 5.000000e-01 : f32
    %19 = vector.broadcast %cst_13 : f32 to vector<8x8xf32>
    %20 = arith.mulf %19, %18 : vector<8x8xf32>
    %cst_14 = arith.constant 0.707106769 : f32
    %21 = vector.broadcast %cst_14 : f32 to vector<8x8xf32>
    %22 = arith.mulf %18, %21 : vector<8x8xf32>
    %23 = math.erf %22 : vector<8x8xf32>
    %cst_15 = arith.constant 1.000000e+00 : f32
    %24 = vector.broadcast %cst_15 : f32 to vector<8x8xf32>
    %25 = arith.addf %24, %23 : vector<8x8xf32>
    %26 = arith.mulf %20, %25 : vector<8x8xf32>
    %c0_16 = arith.constant 0 : index
    %c0_17 = arith.constant 0 : index
    %27 = vector.load %arg6[%c0_16, %c0_17] : memref<8x16xf32, #tpu.memory_space<vmem>>, vector<8x16xf32>
    %c0_18 = arith.constant 0 : index
    %c0_19 = arith.constant 0 : index
    %28 = vector.load %arg7[%c0_18, %c0_19] : memref<1x16xf32, #tpu.memory_space<vmem>>, vector<1x16xf32>
    %cst_20 = arith.constant dense<0.000000e+00> : vector<8x16xf32>
    %29 = tpu.matmul %26, %27, %cst_20 {dimension_numbers = #tpu.dot_dimension_numbers<[1], [0], [0], [1], [0, 0, 1, 1], [], []>} : vector<8x8xf32>, vector<8x16xf32>, vector<8x16xf32> -> vector<8x16xf32>
    %30 = vector.broadcast %28 : vector<1x16xf32> to vector<8x16xf32>
    %31 = arith.addf %29, %30 : vector<8x16xf32>
    %cst_21 = arith.constant 5.000000e-01 : f32
    %32 = vector.broadcast %cst_21 : f32 to vector<8x16xf32>
    %33 = arith.mulf %32, %31 : vector<8x16xf32>
    %cst_22 = arith.constant 0.707106769 : f32
    %34 = vector.broadcast %cst_22 : f32 to vector<8x16xf32>
    %35 = arith.mulf %31, %34 : vector<8x16xf32>
    %36 = math.erf %35 : vector<8x16xf32>
    %cst_23 = arith.constant 1.000000e+00 : f32
    %37 = vector.broadcast %cst_23 : f32 to vector<8x16xf32>
    %38 = arith.addf %37, %36 : vector<8x16xf32>
    %39 = arith.mulf %33, %38 : vector<8x16xf32>
    %40 = arith.addf %39, %13 : vector<8x16xf32>
    %c0_24 = arith.constant 0 : index
    %c0_25 = arith.constant 0 : index
    %41 = vector.load %arg8[%c0_24, %c0_25] : memref<16x32xf32, #tpu.memory_space<vmem>>, vector<16x32xf32>
    %c0_26 = arith.constant 0 : index
    %c0_27 = arith.constant 0 : index
    %42 = vector.load %arg9[%c0_26, %c0_27] : memref<1x32xf32, #tpu.memory_space<vmem>>, vector<1x32xf32>
    %cst_28 = arith.constant dense<0.000000e+00> : vector<8x32xf32>
    %43 = tpu.matmul %40, %41, %cst_28 {dimension_numbers = #tpu.dot_dimension_numbers<[1], [0], [0], [1], [0, 0, 1, 1], [], []>} : vector<8x16xf32>, vector<16x32xf32>, vector<8x32xf32> -> vector<8x32xf32>
    %44 = vector.broadcast %42 : vector<1x32xf32> to vector<8x32xf32>
    %45 = arith.addf %43, %44 : vector<8x32xf32>
    %cst_29 = arith.constant 5.000000e-01 : f32
    %46 = vector.broadcast %cst_29 : f32 to vector<8x32xf32>
    %47 = arith.mulf %46, %45 : vector<8x32xf32>
    %cst_30 = arith.constant 0.707106769 : f32
    %48 = vector.broadcast %cst_30 : f32 to vector<8x32xf32>
    %49 = arith.mulf %45, %48 : vector<8x32xf32>
    %50 = math.erf %49 : vector<8x32xf32>
    %cst_31 = arith.constant 1.000000e+00 : f32
    %51 = vector.broadcast %cst_31 : f32 to vector<8x32xf32>
    %52 = arith.addf %51, %50 : vector<8x32xf32>
    %53 = arith.mulf %47, %52 : vector<8x32xf32>
    %54 = arith.addf %53, %0 : vector<8x32xf32>
    %c0_32 = arith.constant 0 : index
    %c0_33 = arith.constant 0 : index
    %55 = vector.load %arg10[%c0_32, %c0_33] : memref<8x32xf32, #tpu.memory_space<vmem>>, vector<8x32xf32>
    tpu.vector_store %arg10[%c0_32, %c0_33], %54 {strides = array<i32>} : memref<8x32xf32, #tpu.memory_space<vmem>>, vector<8x32xf32>,
    return
  }
  func.func @transform_0(%arg0: i32) -> (i32, i32) {
    %c0_i32 = arith.constant 0 : i32
    %c0_i32_0 = arith.constant 0 : i32
    return %arg0, %c0_i32 : i32, i32
  }
  func.func @transform_1(%arg0: i32) -> (i32, i32) {
    %c0_i32 = arith.constant 0 : i32
    %c0_i32_0 = arith.constant 0 : i32
    %c0_i32_1 = arith.constant 0 : i32
    return %c0_i32, %c0_i32_0 : i32, i32
  }
  func.func @transform_2(%arg0: i32) -> (i32, i32) {
    %c0_i32 = arith.constant 0 : i32
    %c0_i32_0 = arith.constant 0 : i32
    %c0_i32_1 = arith.constant 0 : i32
    return %c0_i32, %c0_i32_0 : i32, i32
  }
  func.func @transform_3(%arg0: i32) -> (i32, i32) {
    %c0_i32 = arith.constant 0 : i32
    %c0_i32_0 = arith.constant 0 : i32
    %c0_i32_1 = arith.constant 0 : i32
    return %c0_i32, %c0_i32_0 : i32, i32
  }
  func.func @transform_4(%arg0: i32) -> (i32, i32) {
    %c0_i32 = arith.constant 0 : i32
    %c0_i32_0 = arith.constant 0 : i32
    %c0_i32_1 = arith.constant 0 : i32
    return %c0_i32, %c0_i32_0 : i32, i32
  }
  func.func @transform_5(%arg0: i32) -> (i32, i32) {
    %c0_i32 = arith.constant 0 : i32
    %c0_i32_0 = arith.constant 0 : i32
    %c0_i32_1 = arith.constant 0 : i32
    return %c0_i32, %c0_i32_0 : i32, i32
  }
  func.func @transform_6(%arg0: i32) -> (i32, i32) {
    %c0_i32 = arith.constant 0 : i32
    %c0_i32_0 = arith.constant 0 : i32
    %c0_i32_1 = arith.constant 0 : i32
    return %c0_i32, %c0_i32_0 : i32, i32
  }
  func.func @transform_7(%arg0: i32) -> (i32, i32) {
    %c0_i32 = arith.constant 0 : i32
    %c0_i32_0 = arith.constant 0 : i32
    %c0_i32_1 = arith.constant 0 : i32
    return %c0_i32, %c0_i32_0 : i32, i32
  }
  func.func @transform_8(%arg0: i32) -> (i32, i32) {
    %c0_i32 = arith.constant 0 : i32
    %c0_i32_0 = arith.constant 0 : i32
    %c0_i32_1 = arith.constant 0 : i32
    return %c0_i32, %c0_i32_0 : i32, i32
  }
  func.func @transform_9(%arg0: i32) -> (i32, i32) {
    %c0_i32 = arith.constant 0 : i32
    %c0_i32_0 = arith.constant 0 : i32
    return %arg0, %c0_i32 : i32, i32
  }
}

module attributes {stable_mosaic.version = 11 : i64} {
  func.func @_fused_block_kernel(%arg0: i32, %arg1: memref<8x32xf32, #tpu.memory_space<vmem>>, %arg2: memref<32x16xf32, #tpu.memory_space<vmem>>, %arg3: memref<1x16xf32, #tpu.memory_space<vmem>>, %arg4: memref<16x8xf32, #tpu.memory_space<vmem>>, %arg5: memref<1x8xf32, #tpu.memory_space<vmem>>, %arg6: memref<8x16xf32, #tpu.memory_space<vmem>>, %arg7: memref<1x16xf32, #tpu.memory_space<vmem>>, %arg8: memref<16x32xf32, #tpu.memory_space<vmem>>, %arg9: memref<1x32xf32, #tpu.memory_space<vmem>>, %arg10: memref<8x32xf32, #tpu.memory_space<vmem>>) attributes {dimension_semantics = [#tpu.dimension_semantics<parallel>], iteration_bounds = array<i64: 2>, scalar_prefetch = 0 : i64, scratch_operands = 0 : i64, tpu.core_type = #tpu.core_type<tc>, window_params = [{transform_indices = @transform_0, window_bounds = array<i64: 8, 32>}, {pipeline_mode = #tpu.pipeline_mode<synchronous>, transform_indices = @transform_1, window_bounds = array<i64: 32, 16>}, {pipeline_mode = #tpu.pipeline_mode<synchronous>, transform_indices = @transform_2, window_bounds = array<i64: 1, 16>}, {pipeline_mode = #tpu.pipeline_mode<synchronous>, transform_indices = @transform_3, window_bounds = array<i64: 16, 8>}, {pipeline_mode = #tpu.pipeline_mode<synchronous>, transform_indices = @transform_4, window_bounds = array<i64: 1, 8>}, {pipeline_mode = #tpu.pipeline_mode<synchronous>, transform_indices = @transform_5, window_bounds = array<i64: 8, 16>}, {pipeline_mode = #tpu.pipeline_mode<synchronous>, transform_indices = @transform_6, window_bounds = array<i64: 1, 16>}, {pipeline_mode = #tpu.pipeline_mode<synchronous>, transform_indices = @transform_7, window_bounds = array<i64: 16, 32>}, {pipeline_mode = #tpu.pipeline_mode<synchronous>, transform_indices = @transform_8, window_bounds = array<i64: 1, 32>}, {transform_indices = @transform_9, window_bounds = array<i64: 8, 32>}]} {
    %c0 = arith.constant 0 : index
    %c0_0 = arith.constant 0 : index
    %0 = vector.load %arg1[%c0, %c0_0] : memref<8x32xf32, #tpu.memory_space<vmem>>, vector<8x32xf32>
    %c0_1 = arith.constant 0 : index
    %c0_2 = arith.constant 0 : index
    %1 = vector.load %arg2[%c0_1, %c0_2] : memref<32x16xf32, #tpu.memory_space<vmem>>, vector<32x16xf32>
    %c0_3 = arith.constant 0 : index
    %c0_4 = arith.constant 0 : index
    %2 = vector.load %arg3[%c0_3, %c0_4] : memref<1x16xf32, #tpu.memory_space<vmem>>, vector<1x16xf32>
    %cst = arith.constant dense<0.000000e+00> : vector<8x16xf32>
    %3 = tpu.matmul %0, %1, %cst {dimension_numbers = #tpu.dot_dimension_numbers<[1], [0], [0], [1], [0, 0, 1, 1], [], []>} : vector<8x32xf32>, vector<32x16xf32>, vector<8x16xf32> -> vector<8x16xf32>
    %4 = vector.broadcast %2 : vector<1x16xf32> to vector<8x16xf32>
    %5 = arith.addf %3, %4 : vector<8x16xf32>
    %cst_5 = arith.constant 5.000000e-01 : f32
    %6 = vector.broadcast %cst_5 : f32 to vector<8x16xf32>
    %7 = arith.mulf %6, %5 : vector<8x16xf32>
    %cst_6 = arith.constant 0.707106769 : f32
    %8 = vector.broadcast %cst_6 : f32 to vector<8x16xf32>
    %9 = arith.mulf %5, %8 : vector<8x16xf32>
    %10 = math.erf %9 : vector<8x16xf32>
    %cst_7 = arith.constant 1.000000e+00 : f32
    %11 = vector.broadcast %cst_7 : f32 to vector<8x16xf32>
    %12 = arith.addf %11, %10 : vector<8x16xf32>
    %13 = arith.mulf %7, %12 : vector<8x16xf32>
    %c0_8 = arith.constant 0 : index
    %c0_9 = arith.constant 0 : index
    %14 = vector.load %arg4[%c0_8, %c0_9] : memref<16x8xf32, #tpu.memory_space<vmem>>, vector<16x8xf32>
    %c0_10 = arith.constant 0 : index
    %c0_11 = arith.constant 0 : index
    %15 = vector.load %arg5[%c0_10, %c0_11] : memref<1x8xf32, #tpu.memory_space<vmem>>, vector<1x8xf32>
    %cst_12 = arith.constant dense<0.000000e+00> : vector<8x8xf32>
    %16 = tpu.matmul %13, %14, %cst_12 {dimension_numbers = #tpu.dot_dimension_numbers<[1], [0], [0], [1], [0, 0, 1, 1], [], []>} : vector<8x16xf32>, vector<16x8xf32>, vector<8x8xf32> -> vector<8x8xf32>
    %17 = vector.broadcast %15 : vector<1x8xf32> to vector<8x8xf32>
    %18 = arith.addf %16, %17 : vector<8x8xf32>
    %cst_13 = arith.constant 5.000000e-01 : f32
    %19 = vector.broadcast %cst_13 : f32 to vector<8x8xf32>
    %20 = arith.mulf %19, %18 : vector<8x8xf32>
    %cst_14 = arith.constant 0.707106769 : f32
    %21 = vector.broadcast %cst_14 : f32 to vector<8x8xf32>
    %22 = arith.mulf %18, %21 : vector<8x8xf32>
    %23 = math.erf %22 : vector<8x8xf32>
    %cst_15 = arith.constant 1.000000e+00 : f32
    %24 = vector.broadcast %cst_15 : f32 to vector<8x8xf32>
    %25 = arith.addf %24, %23 : vector<8x8xf32>
    %26 = arith.mulf %20, %25 : vector<8x8xf32>
    %c0_16 = arith.constant 0 : index
    %c0_17 = arith.constant 0 : index
    %27 = vector.load %arg6[%c0_16, %c0_17] : memref<8x16xf32, #tpu.memory_space<vmem>>, vector<8x16xf32>
    %c0_18 = arith.constant 0 : index
    %c0_19 = arith.constant 0 : index
    %28 = vector.load %arg7[%c0_18, %c0_19] : memref<1x16xf32, #tpu.memory_space<vmem>>, vector<1x16xf32>
    %cst_20 = arith.constant dense<0.000000e+00> : vector<8x16xf32>
    %29 = tpu.matmul %26, %27, %cst_20 {dimension_numbers = #tpu.dot_dimension_numbers<[1], [0], [0], [1], [0, 0, 1, 1], [], []>} : vector<8x8xf32>, vector<8x16xf32>, vector<8x16xf32> -> vector<8x16xf32>
    %30 = vector.broadcast %28 : vector<1x16xf32> to vector<8x16xf32>
    %31 = arith.addf %29, %30 : vector<8x16xf32>
    %cst_21 = arith.constant 5.000000e-01 : f32
    %32 = vector.broadcast %cst_21 : f32 to vector<8x16xf32>
    %33 = arith.mulf %32, %31 : vector<8x16xf32>
    %cst_22 = arith.constant 0.707106769 : f32
    %34 = vector.broadcast %cst_22 : f32 to vector<8x16xf32>
    %35 = arith.mulf %31, %34 : vector<8x16xf32>
    %36 = math.erf %35 : vector<8x16xf32>
    %cst_23 = arith.constant 1.000000e+00 : f32
    %37 = vector.broadcast %cst_23 : f32 to vector<8x16xf32>
    %38 = arith.addf %37, %36 : vector<8x16xf32>
    %39 = arith.mulf %33, %38 : vector<8x16xf32>
    %40 = arith.addf %39, %13 : vector<8x16xf32>
    %c0_24 = arith.constant 0 : index
    %c0_25 = arith.constant 0 : index
    %41 = vector.load %arg8[%c0_24, %c0_25] : memref<16x32xf32, #tpu.memory_space<vmem>>, vector<16x32xf32>
    %c0_26 = arith.constant 0 : index
    %c0_27 = arith.constant 0 : index
    %42 = vector.load %arg9[%c0_26, %c0_27] : memref<1x32xf32, #tpu.memory_space<vmem>>, vector<1x32xf32>
    %cst_28 = arith.constant dense<0.000000e+00> : vector<8x32xf32>
    %43 = tpu.matmul %40, %41, %cst_28 {dimension_numbers = #tpu.dot_dimension_numbers<[1], [0], [0], [1], [0, 0, 1, 1], [], []>} : vector<8x16xf32>, vector<16x32xf32>, vector<8x32xf32> -> vector<8x32xf32>
    %44 = vector.broadcast %42 : vector<1x32xf32> to vector<8x32xf32>
    %45 = arith.addf %43, %44 : vector<8x32xf32>
    %cst_29 = arith.constant 5.000000e-01 : f32
    %46 = vector.broadcast %cst_29 : f32 to vector<8x32xf32>
    %47 = arith.mulf %46, %45 : vector<8x32xf32>
    %cst_30 = arith.constant 0.707106769 : f32
    %48 = vector.broadcast %cst_30 : f32 to vector<8x32xf32>
    %49 = arith.mulf %45, %48 : vector<8x32xf32>
    %50 = math.erf %49 : vector<8x32xf32>
    %cst_31 = arith.constant 1.000000e+00 : f32
    %51 = vector.broadcast %cst_31 : f32 to vector<8x32xf32>
    %52 = arith.addf %51, %50 : vector<8x32xf32>
    %53 = arith.mulf %47, %52 : vector<8x32xf32>
    %54 = arith.addf %53, %0 : vector<8x32xf32>
    %c0_32 = arith.constant 0 : index
    %c0_33 = arith.constant 0 : index
    %55 = vector.load %arg10[%c0_32, %c0_33] : memref<8x32xf32, #tpu.memory_space<vmem>>, vector<8x32xf32>
    tpu.vector_store %arg10[%c0_32, %c0_33], %54 {strides = array<i32>} : memref<8x32xf32, #tpu.memory_space<vmem>>, vector<8x32xf32>,
    return
  }
  func.func @transform_0(%arg0: i32) -> (i32, i32) {
    %c0_i32 = arith.constant 0 : i32
    %c0_i32_0 = arith.constant 0 : i32
    return %arg0, %c0_i32 : i32, i32
  }
  func.func @transform_1(%arg0: i32) -> (i32, i32) {
    %c0_i32 = arith.constant 0 : i32
    %c0_i32_0 = arith.constant 0 : i32
    %c0_i32_1 = arith.constant 0 : i32
    return %c0_i32, %c0_i32_0 : i32, i32
  }
  func.func @transform_2(%arg0: i32) -> (i32, i32) {
    %c0_i32 = arith.constant 0 : i32
    %c0_i32_0 = arith.constant 0 : i32
    %c0_i32_1 = arith.constant 0 : i32
    return %c0_i32, %c0_i32_0 : i32, i32
  }
  func.func @transform_3(%arg0: i32) -> (i32, i32) {
    %c0_i32 = arith.constant 0 : i32
    %c0_i32_0 = arith.constant 0 : i32
    %c0_i32_1 = arith.constant 0 : i32
    return %c0_i32, %c0_i32_0 : i32, i32
  }
  func.func @transform_4(%arg0: i32) -> (i32, i32) {
    %c0_i32 = arith.constant 0 : i32
    %c0_i32_0 = arith.constant 0 : i32
    %c0_i32_1 = arith.constant 0 : i32
    return %c0_i32, %c0_i32_0 : i32, i32
  }
  func.func @transform_5(%arg0: i32) -> (i32, i32) {
    %c0_i32 = arith.constant 0 : i32
    %c0_i32_0 = arith.constant 0 : i32
    %c0_i32_1 = arith.constant 0 : i32
    return %c0_i32, %c0_i32_0 : i32, i32
  }
  func.func @transform_6(%arg0: i32) -> (i32, i32) {
    %c0_i32 = arith.constant 0 : i32
    %c0_i32_0 = arith.constant 0 : i32
    %c0_i32_1 = arith.constant 0 : i32
    return %c0_i32, %c0_i32_0 : i32, i32
  }
  func.func @transform_7(%arg0: i32) -> (i32, i32) {
    %c0_i32 = arith.constant 0 : i32
    %c0_i32_0 = arith.constant 0 : i32
    %c0_i32_1 = arith.constant 0 : i32
    return %c0_i32, %c0_i32_0 : i32, i32
  }
  func.func @transform_8(%arg0: i32) -> (i32, i32) {
    %c0_i32 = arith.constant 0 : i32
    %c0_i32_0 = arith.constant 0 : i32
    %c0_i32_1 = arith.constant 0 : i32
    return %c0_i32, %c0_i32_0 : i32, i32
  }
  func.func @transform_9(%arg0: i32) -> (i32, i32) {
    %c0_i32 = arith.constant 0 : i32
    %c0_i32_0 = arith.constant 0 : i32
    return %arg0, %c0_i32 : i32, i32
  }
}

</mosaic_0001>

<bundles_post_ra>
// kernel: tpu_custom_call.1
= control target key start
LH: loop header
LB: loop body
LE: loop exit
PB: predicated region body
PF: predicated region fallthrough
CT: control target
= control target key end

     0   :  { %14 = vsyncpa [#allocation3], 0  ;;  %s1149_s0 = inlined_call_operand.vmem [shape: f32[16,32], index: 0, kind: input, shape index: {}]   ;;  %s1150_s1 = inlined_call_operand.vmem [shape: f32[32,16], index: 1, kind: input, shape index: {}]   ;;  %s1151_s2 = inlined_call_operand.vmem [shape: f32[1,16], index: 2, kind: input, shape index: {}]   ;;  %s1152_s3 = inlined_call_operand.vmem [shape: f32[16,8], index: 3, kind: input, shape index: {}]   ;;  %s1153_s4 = inlined_call_operand.vmem [shape: f32[1,8], index: 4, kind: input, shape index: {}]   ;;  %s1154_s5 = inlined_call_operand.vmem [shape: f32[8,16], index: 5, kind: input, shape index: {}]   ;;  %s1155_s6 = inlined_call_operand.vmem [shape: f32[1,16], index: 6, kind: input, shape index: {}]   ;;  %s1156_s7 = inlined_call_operand.vmem [shape: f32[16,32], index: 7, kind: input, shape index: {}]   ;;  %s1157_s8 = inlined_call_operand.vmem [shape: f32[1,32], index: 8, kind: input, shape index: {}]   ;;  %s1158_s9 = inlined_call_operand.hbm [shape: f32[16,32], index: 9, kind: output, shape index: {}]  }
   0x1   :  { %16 = vsyncpa [#allocation3 + $0x1], 0  ;;  %s998_s30 = smov 0   ;;  %s1000_s10 = smov 0  }
   0x2   :  { %s1002_s11 = smov 0   ;;  %s1004_s12 = smov 0  }
   0x3 LB: > { %s1019_s13 = sadd.s32 4294967295, %s942_s12   ;;  %s757_s14 = sadd.s32 4294967294, %s942_s12   ;;  %s942_s12 = sphi %s1004_s12, %s1164_s12   ;;  %s938_s11 = sphi %s1002_s11, %s1163_s11   ;;  %s934_s10 = sphi %s1000_s10, %s1162_s10   ;;  %s930_s30 = sphi %s998_s30, %s1161_s30  }
   0x4   : > { %s1023_s15 = sadd.s32 1, %s942_s12   ;;  %s223_s16 = sadd.s32 1, %s938_s11 }
   0x5   : > { %s220_s17 = ssub.s32 %s942_s12, %s1023_s15  ;;  %p233_p0 = scmp.ne.s32.totalorder %s938_s11, %s934_s10 }
   0x6   : > { %p221_p1 = scmp.eq.s32.totalorder %s220_s17, 0  ;;  %p234_p2 = scmp.eq.s32.totalorder %s1019_s13, 1 }
   0x7   : > { %p239_p3 = scmp.ne.s32.totalorder %s934_s10, %s930_s30  ;;  %p240_p4 = scmp.eq.s32.totalorder %s757_s14, 1 }
   0x8   : > { %s1034_s18 = scalar_select %p221_p1, %s938_s11, %s223_s16  }
   0x9   : > { %p1036_p5 = por %p234_p2, %p233_p0  ;;  %p1040_p6 = por %p240_p4, %p239_p3 }
   0xa   : > { %p760_p7 = scmp.ge.s32.totalorder %s942_s12, 1  ;;  %p289_p8 = scmp.lt.s32.totalorder %s942_s12, 3 }
   0xc   : > { %p290_p9 = pnand %p760_p7, %p289_p8 }
   0xd   : > { %v329_v0 = vld [vmem:[%s1150_s1] sm:$0xff] (!%p290_p9)  ;;  %v330_v1 = vld [vmem:[%s1150_s1 + $0x8] sm:$0xff] (!%p290_p9)  ;;  %v331_v2 = vld [vmem:[%s1150_s1 + $0x10] sm:$0xff] (!%p290_p9)  ;;  %v944_v3 = vmov (!%p290_p9), 0.0|0.0   ;;  %vm945_vm0 = vmmov (!%p290_p9), 0   ;;  %v946_v6 = vmov (!%p290_p9), 0.0  }
   0xe   : > { %293 = sbr.rel (%p290_p9) target bundleno = 968 (0x3c8), region = 56  ;;  %818 = vmatprep.subr.bf16.mxu0 (!%p290_p9), %v944_v3  ;;  %v819_v4 = vpack.c.bf16 (!%p290_p9), %v330_v1, %v329_v0  ;;  %v332_v5 = vld [vmem:[%s1150_s1 + $0x18] sm:$0xff] (!%p290_p9)  ;;  %796 = vmatprep.mubr.msk.f32.mxu0 (!%p290_p9), %vm945_vm0, %v946_v6  ;;  %p324_p10 = scmp.lt.s32.totalorder (!%p290_p9), %s1019_s13, 1  ;;  %vm340_vm1 = vcmask (!%p290_p9), 261120   ;;  %v419_v9 = vld [vmem:[%s1152_s3] sm:$0xff] (!%p290_p9)  ;;  %v420_v10 = vld [vmem:[%s1152_s3 + $0x8] sm:$0xff] (!%p290_p9) }
   0xf   : > { %824 = vmatprep.subr.bf16.mxu1 (!%p290_p9), %v944_v3  ;;  %803 = vmatprep.mubr.msk.f32.mxu1 (!%p290_p9), %vm945_vm0, %v946_v6  ;;  %v822_v7 = vpack.c.bf16 (!%p290_p9), %v332_v5, %v331_v2  ;;  %v825_v11 = vpack.c.bf16 (!%p290_p9), %v420_v10, %v419_v9  ;;  %v763_v12 = vld [vmem:[%s1151_s2] ss:$0 sm:$0xff] (!%p290_p9)  ;;  %vm428_vm2 = vcmask (!%p290_p9), 130048   ;;  %vm515_vm3 = vcmask (!%p290_p9), 64512   ;;  %v596_v32 = vld [vmem:[%s1156_s7 + $0x8] sm:$0xff] (!%p290_p9)  ;;  %s321_s28 = sand.u32 (!%p290_p9), 1, %s934_s10  }
  0x10   : > { %820 = vmatpush3.bf16.msra.mxu0 (!%p290_p9), %v819_v4  ;;  %v507_v21 = vld [vmem:[%s1154_s5] sm:$0xff] (!%p290_p9)  ;;  %s685_s24 = scalar_lea.sflag (!%p290_p9), [#allocation3], %s321_s28 }
  0x11   : > { %821 = vmatprep.subr.bf16.mxu0 (!%p290_p9), %v944_v3  ;;  %826 = vmatpush3.bf16.msra.mxu1 (!%p290_p9), %v825_v11  ;;  %v765_v22 = vld [vmem:[%s1153_s4] ss:$0 sm:$0xff] (!%p290_p9) }
  0x12   : > { %806 = vmatprep.subr.mxu1 (!%p290_p9), %v946_v6  ;;  %v595_v31 = vld [vmem:[%s1156_s7] sm:$0xff] (!%p290_p9) }
  0x13   : > { %v828_v33 = vpack.c.bf16 (!%p290_p9), %v596_v32, %v595_v31  ;;  %v767_v34 = vld [vmem:[%s1155_s6] ss:$0 sm:$0xff] (!%p290_p9) }
  0x14   : > { %823 = vmatpush3.bf16.msra.mxu0 (!%p290_p9), %v822_v7  ;;  %v769_v44 = vld [vmem:[%s1157_s8] ss:$0 sm:$0xff] (!%p290_p9) }
  0x15   : > { %s325_s29 = scalar_select %p324_p10, %s1019_s13, 1  ;;  %827 = vmatprep.subr.bf16.mxu0 %v944_v3 }
  0x17   : > { %s762_s14 = sshll.u32 %s325_s29, 3  ;;  %s761_s29 = sshll.u32 %s321_s28, 3 }
  0x18   : > { %s327_s21 = scalar_lea.vmem %s1149_s0, %s762_s14  ;;  %s772_s14 = sshll.u32 %s1019_s13, 7 }
  0x19   : > { %v1065_v8 = vld [vmem:[%s327_s21] sm:$0xff]  ;;  %s323_s16 = scalar_lea.vmem [#allocation2], %s761_s29  ;;  %s1106_s23 = scalar_lea.hbm %s1158_s9, %s772_s14 }
  0x1a   : > { %797 = vmatmul.mubr.msk.f32.vlgmr.msra.gmra.mrb[0].mxu0 %vm340_vm1, %v1065_v8  ;;  %s698_s17 = sshll.u32 %s323_s16, 4  ;;  %s947_s13 = smov [#allocation2]   ;;  %s1108_s17 = int_to_ptr.vmem [resolvable:$true] %s698_s17 }
  0x1b   : > { %815 = vmatprep.mubr.msk.f32.mxu0 %vm945_vm0, %v946_v6  ;;  %829 = vmatpush3.bf16.msra.mxu0 %v828_v33  ;;  %s880_s25 = scalar_lea.vmem %s1108_s17, 128  ;;  %s884_s26 = sshll.u32 %s947_s13, 4  ;;  %s885_s26 = int_to_ptr.vmem [resolvable:$false] %s884_s26 }
  0x1c   : > { %p881_p11 = scmp.ne.s32.totalorder %s1108_s17, %s880_s25  ;;  %s886_s27 = scalar_lea.vmem %s885_s26, 256 }
  0x1d   : > { %p887_p0 = scmp.lt.s32.totalorder %s1108_s17, %s885_s26  ;;  %p888_p1 = scmp.lt.s32.totalorder %s886_s27, %s880_s25 }
  0x1e   : > { %p882_p12 = pnand %p881_p11, %p1036_p5 }
  0x1f   : > { %p889_p2 = por %p888_p1, %p887_p0 }
  0x20   : > { %p883_p13 = pneg %p882_p12 }
  0x22   : > { %p890_p3 = pnand %p889_p2, %p883_p13 }
  0xed   : > { %v410_v13 = vpop.f32.mrb[0].mxu0 }
  0xee   : > { %v411_v14 = vadd.f32 %v763_v12, %v410_v13  ;;  %v798_v15 = vpop.f32.mrb[1].mxu0 }
  0xf0   : > { %v415_v16 = vmul.f32 0.70710677, %v411_v14  ;;  %v414_v18 = vmul.f32 0.5, %v411_v14 }
  0xf2   : > { %872 = verf.f32 %v415_v16 }
  0xfc   : > { %v873_v17 = vpop.eup %872 }
  0xfd   : > { %v417_v19 = vadd.f32 1.0, %v873_v17 }
  0xff   : > { %v418_v20 = vmul.f32 %v417_v19, %v414_v18 }
 0x101   : > { %804 = vmatmul.mubr.msk.f32.vlgmr.msra.gmra.mrb[0].mxu1 %vm428_vm2, %v418_v20 }
 0x102   : > { %808 = vmatprep.mubr.msk.f32.mxu1 %vm945_vm0, %v946_v6  ;;  %807 = vmatpush3.msra.mxu1 %v507_v21 }
 0x1d4   : > { %v498_v23 = vpop.f32.mrb[0].mxu1 }
 0x1d5   : > { %v499_v24 = vadd.f32 %v765_v22, %v498_v23  ;;  %v805_v25 = vpop.f32.mrb[1].mxu1 }
 0x1d7   : > { %v503_v26 = vmul.f32 0.70710677, %v499_v24  ;;  %v502_v28 = vmul.f32 0.5, %v499_v24 }
 0x1d9   : > { %874 = verf.f32 %v503_v26 }
 0x1e3   : > { %v875_v27 = vpop.eup %874 }
 0x1e4   : > { %v505_v29 = vadd.f32 1.0, %v875_v27 }
 0x1e6   : > { %v506_v30 = vmul.f32 %v505_v29, %v502_v28 }
 0x1e8   : > { %809 = vmatmul.mubr.msk.f32.vlgmr.msra.gmra.mrb[2].mxu1 %vm515_vm3, %v506_v30 }
 0x2bb   : > { %v585_v35 = vpop.f32.mrb[2].mxu1 }
 0x2bc   : > { %v586_v36 = vadd.f32 %v767_v34, %v585_v35  ;;  %v810_v37 = vpop.f32.mrb[3].mxu1 }
 0x2be   : > { %v590_v38 = vmul.f32 0.70710677, %v586_v36  ;;  %v589_v40 = vmul.f32 0.5, %v586_v36 }
 0x2c0   : > { %876 = verf.f32 %v590_v38 }
 0x2ca   : > { %v877_v39 = vpop.eup %876 }
 0x2cb   : > { %v592_v41 = vadd.f32 1.0, %v877_v39 }
 0x2cd   : > { %v593_v42 = vmul.f32 %v592_v41, %v589_v40 }
 0x2cf   : > { %v594_v43 = vadd.f32 %v593_v42, %v418_v20 }
 0x2d1   : > { %816 = vmatmul.mubr.msk.f32.vlgmr.msra.gmra.mrb[2].mxu0 %vm428_vm2, %v594_v43 }
 0x3a4   : > { %v673_v45 = vpop.f32.mrb[2].mxu0 }
 0x3a5   : > { %v674_v46 = vadd.f32 %v769_v44, %v673_v45  ;;  %v817_v47 = vpop.f32.mrb[3].mxu0 }
 0x3a7   : > { %v678_v48 = vmul.f32 0.70710677, %v674_v46  ;;  %v677_v50 = vmul.f32 0.5, %v674_v46 }
 0x3a9   : > { %878 = verf.f32 %v678_v48 }
 0x3b3   : > { %v879_v49 = vpop.eup %878 }
 0x3b4   : > { %v680_v51 = vadd.f32 1.0, %v879_v49 }
 0x3b6   : > { %v681_v52 = vmul.f32 %v680_v51, %v677_v50 }
 0x3b8   : > { %v682_v53 = vadd.f32 %v681_v52, %v1065_v8 }
 0x3ba   : > { %683 = vst.msk [vmem:[%s323_s16] sm:$0xff] %vm340_vm1, %v682_v53 }
 0x3bb   : > { %893 = shalt.err (!%p890_p3)
}
 0x3bc   : > { %s894_s28 = scalar_lea.hbm %s1106_s23, 128  ;;  %s898_s16 = scalar_lea.hbm %s1158_s9, 256 }
 0x3bd   : > { %p895_p4 = scmp.ne.s32.totalorder %s1106_s23, %s894_s28  ;;  %p899_p9 = scmp.lt.u32.totalorder %s1106_s23, %s1158_s9 }
 0x3be   : > { %p900_p10 = scmp.lt.u32.totalorder %s898_s16, %s894_s28  ;;  %p902_p12 = scmp.lt.u32.totalorder %s894_s28, %s1106_s23 }
 0x3bf   : > { %p896_p7 = pnand %p895_p4, %p1036_p5 }
 0x3c0   : > { %p901_p11 = por %p900_p10, %p899_p9 }
 0x3c1   : > { %p897_p8 = pneg %p896_p7 }
 0x3c2   : > { %p903_p13 = por %p902_p12, %p901_p11 }
 0x3c4   : > { %p904_p0 = pnand %p903_p13, %p897_p8 }
 0x3c6   : > { %907 = shalt.err (!%p904_p0)
}
 0x3c7   : > { %830 = dma.vmem_to_hbm [thread:$0]  (%p1036_p5), %s1108_s17, 128, %s1106_s23, %s685_s24  }
 0x3c8 PF: > { %p836_p1 = scmp.ge.s32.totalorder %s942_s12, 2  ;;  %s710_s25 = sand.u32 1, %s930_s30  }
 0x3c9   : > { %s711_s13 = scalar_lea.sflag [#allocation3], %s710_s25 }
 0x3ca   : > { %p833_p2 = pnand %p836_p1, %p1040_p6 }
 0x3cc   : > { %925 = dma.done.wait (!%p833_p2), %s711_s13, 128  }
 0x3cd   : > { %927 = vsyncadd (!%p833_p2), %s711_s13, 4294967168  ;;  %p19_p3 = scmp.ge.s32.totalorder %s1023_s15, 4   ;;  %s1161_s30 = smov %s934_s10 }
 0x3ce   : > { %s1162_s10 = smov %s938_s11  ;;  %s1163_s11 = smov %s1034_s18 }
 0x3cf   : > { %s1164_s12 = smov %s1023_s15  ;;  %21 = sbr.rel (!%p19_p3) target bundleno = 3 (0x3), region = 91 }
 0x3d6   :  { %716 = vsyncpa [#allocation3], 1 }
 0x3d7   :  { %718 = vsyncpa [#allocation3 + $0x1], 1 }

// kernel: tpu_custom_call.1
= control target key start
LH: loop header
LB: loop body
LE: loop exit
PB: predicated region body
PF: predicated region fallthrough
CT: control target
= control target key end

     0   :  { %14 = vsyncpa [#allocation3], 0  ;;  %s1149_s0 = inlined_call_operand.vmem [shape: f32[16,32], index: 0, kind: input, shape index: {}]   ;;  %s1150_s1 = inlined_call_operand.vmem [shape: f32[32,16], index: 1, kind: input, shape index: {}]   ;;  %s1151_s2 = inlined_call_operand.vmem [shape: f32[1,16], index: 2, kind: input, shape index: {}]   ;;  %s1152_s3 = inlined_call_operand.vmem [shape: f32[16,8], index: 3, kind: input, shape index: {}]   ;;  %s1153_s4 = inlined_call_operand.vmem [shape: f32[1,8], index: 4, kind: input, shape index: {}]   ;;  %s1154_s5 = inlined_call_operand.vmem [shape: f32[8,16], index: 5, kind: input, shape index: {}]   ;;  %s1155_s6 = inlined_call_operand.vmem [shape: f32[1,16], index: 6, kind: input, shape index: {}]   ;;  %s1156_s7 = inlined_call_operand.vmem [shape: f32[16,32], index: 7, kind: input, shape index: {}]   ;;  %s1157_s8 = inlined_call_operand.vmem [shape: f32[1,32], index: 8, kind: input, shape index: {}]   ;;  %s1158_s9 = inlined_call_operand.hbm [shape: f32[16,32], index: 9, kind: output, shape index: {}]  }
   0x1   :  { %16 = vsyncpa [#allocation3 + $0x1], 0  ;;  %s998_s30 = smov 0   ;;  %s1000_s10 = smov 0  }
   0x2   :  { %s1002_s11 = smov 0   ;;  %s1004_s12 = smov 0  }
   0x3 LB: > { %s1019_s13 = sadd.s32 4294967295, %s942_s12   ;;  %s757_s14 = sadd.s32 4294967294, %s942_s12   ;;  %s942_s12 = sphi %s1004_s12, %s1164_s12   ;;  %s938_s11 = sphi %s1002_s11, %s1163_s11   ;;  %s934_s10 = sphi %s1000_s10, %s1162_s10   ;;  %s930_s30 = sphi %s998_s30, %s1161_s30  }
   0x4   : > { %s1023_s15 = sadd.s32 1, %s942_s12   ;;  %s223_s16 = sadd.s32 1, %s938_s11 }
   0x5   : > { %s220_s17 = ssub.s32 %s942_s12, %s1023_s15  ;;  %p233_p0 = scmp.ne.s32.totalorder %s938_s11, %s934_s10 }
   0x6   : > { %p221_p1 = scmp.eq.s32.totalorder %s220_s17, 0  ;;  %p234_p2 = scmp.eq.s32.totalorder %s1019_s13, 1 }
   0x7   : > { %p239_p3 = scmp.ne.s32.totalorder %s934_s10, %s930_s30  ;;  %p240_p4 = scmp.eq.s32.totalorder %s757_s14, 1 }
   0x8   : > { %s1034_s18 = scalar_select %p221_p1, %s938_s11, %s223_s16  }
   0x9   : > { %p1036_p5 = por %p234_p2, %p233_p0  ;;  %p1040_p6 = por %p240_p4, %p239_p3 }
   0xa   : > { %p760_p7 = scmp.ge.s32.totalorder %s942_s12, 1  ;;  %p289_p8 = scmp.lt.s32.totalorder %s942_s12, 3 }
   0xc   : > { %p290_p9 = pnand %p760_p7, %p289_p8 }
   0xd   : > { %v329_v0 = vld [vmem:[%s1150_s1] sm:$0xff] (!%p290_p9)  ;;  %v330_v1 = vld [vmem:[%s1150_s1 + $0x8] sm:$0xff] (!%p290_p9)  ;;  %v331_v2 = vld [vmem:[%s1150_s1 + $0x10] sm:$0xff] (!%p290_p9)  ;;  %v944_v3 = vmov (!%p290_p9), 0.0|0.0   ;;  %vm945_vm0 = vmmov (!%p290_p9), 0   ;;  %v946_v6 = vmov (!%p290_p9), 0.0  }
   0xe   : > { %293 = sbr.rel (%p290_p9) target bundleno = 968 (0x3c8), region = 56  ;;  %818 = vmatprep.subr.bf16.mxu0 (!%p290_p9), %v944_v3  ;;  %v819_v4 = vpack.c.bf16 (!%p290_p9), %v330_v1, %v329_v0  ;;  %v332_v5 = vld [vmem:[%s1150_s1 + $0x18] sm:$0xff] (!%p290_p9)  ;;  %796 = vmatprep.mubr.msk.f32.mxu0 (!%p290_p9), %vm945_vm0, %v946_v6  ;;  %p324_p10 = scmp.lt.s32.totalorder (!%p290_p9), %s1019_s13, 1  ;;  %vm340_vm1 = vcmask (!%p290_p9), 261120   ;;  %v419_v9 = vld [vmem:[%s1152_s3] sm:$0xff] (!%p290_p9)  ;;  %v420_v10 = vld [vmem:[%s1152_s3 + $0x8] sm:$0xff] (!%p290_p9) }
   0xf   : > { %824 = vmatprep.subr.bf16.mxu1 (!%p290_p9), %v944_v3  ;;  %803 = vmatprep.mubr.msk.f32.mxu1 (!%p290_p9), %vm945_vm0, %v946_v6  ;;  %v822_v7 = vpack.c.bf16 (!%p290_p9), %v332_v5, %v331_v2  ;;  %v825_v11 = vpack.c.bf16 (!%p290_p9), %v420_v10, %v419_v9  ;;  %v763_v12 = vld [vmem:[%s1151_s2] ss:$0 sm:$0xff] (!%p290_p9)  ;;  %vm428_vm2 = vcmask (!%p290_p9), 130048   ;;  %vm515_vm3 = vcmask (!%p290_p9), 64512   ;;  %v596_v32 = vld [vmem:[%s1156_s7 + $0x8] sm:$0xff] (!%p290_p9)  ;;  %s321_s28 = sand.u32 (!%p290_p9), 1, %s934_s10  }
  0x10   : > { %820 = vmatpush3.bf16.msra.mxu0 (!%p290_p9), %v819_v4  ;;  %v507_v21 = vld [vmem:[%s1154_s5] sm:$0xff] (!%p290_p9)  ;;  %s685_s24 = scalar_lea.sflag (!%p290_p9), [#allocation3], %s321_s28 }
  0x11   : > { %821 = vmatprep.subr.bf16.mxu0 (!%p290_p9), %v944_v3  ;;  %826 = vmatpush3.bf16.msra.mxu1 (!%p290_p9), %v825_v11  ;;  %v765_v22 = vld [vmem:[%s1153_s4] ss:$0 sm:$0xff] (!%p290_p9) }
  0x12   : > { %806 = vmatprep.subr.mxu1 (!%p290_p9), %v946_v6  ;;  %v595_v31 = vld [vmem:[%s1156_s7] sm:$0xff] (!%p290_p9) }
  0x13   : > { %v828_v33 = vpack.c.bf16 (!%p290_p9), %v596_v32, %v595_v31  ;;  %v767_v34 = vld [vmem:[%s1155_s6] ss:$0 sm:$0xff] (!%p290_p9) }
  0x14   : > { %823 = vmatpush3.bf16.msra.mxu0 (!%p290_p9), %v822_v7  ;;  %v769_v44 = vld [vmem:[%s1157_s8] ss:$0 sm:$0xff] (!%p290_p9) }
  0x15   : > { %s325_s29 = scalar_select %p324_p10, %s1019_s13, 1  ;;  %827 = vmatprep.subr.bf16.mxu0 %v944_v3 }
  0x17   : > { %s762_s14 = sshll.u32 %s325_s29, 3  ;;  %s761_s29 = sshll.u32 %s321_s28, 3 }
  0x18   : > { %s327_s21 = scalar_lea.vmem %s1149_s0, %s762_s14  ;;  %s772_s14 = sshll.u32 %s1019_s13, 7 }
  0x19   : > { %v1065_v8 = vld [vmem:[%s327_s21] sm:$0xff]  ;;  %s323_s16 = scalar_lea.vmem [#allocation2], %s761_s29  ;;  %s1106_s23 = scalar_lea.hbm %s1158_s9, %s772_s14 }
  0x1a   : > { %797 = vmatmul.mubr.msk.f32.vlgmr.msra.gmra.mrb[0].mxu0 %vm340_vm1, %v1065_v8  ;;  %s698_s17 = sshll.u32 %s323_s16, 4  ;;  %s947_s13 = smov [#allocation2]   ;;  %s1108_s17 = int_to_ptr.vmem [resolvable:$true] %s698_s17 }
  0x1b   : > { %815 = vmatprep.mubr.msk.f32.mxu0 %vm945_vm0, %v946_v6  ;;  %829 = vmatpush3.bf16.msra.mxu0 %v828_v33  ;;  %s880_s25 = scalar_lea.vmem %s1108_s17, 128  ;;  %s884_s26 = sshll.u32 %s947_s13, 4  ;;  %s885_s26 = int_to_ptr.vmem [resolvable:$false] %s884_s26 }
  0x1c   : > { %p881_p11 = scmp.ne.s32.totalorder %s1108_s17, %s880_s25  ;;  %s886_s27 = scalar_lea.vmem %s885_s26, 256 }
  0x1d   : > { %p887_p0 = scmp.lt.s32.totalorder %s1108_s17, %s885_s26  ;;  %p888_p1 = scmp.lt.s32.totalorder %s886_s27, %s880_s25 }
  0x1e   : > { %p882_p12 = pnand %p881_p11, %p1036_p5 }
  0x1f   : > { %p889_p2 = por %p888_p1, %p887_p0 }
  0x20   : > { %p883_p13 = pneg %p882_p12 }
  0x22   : > { %p890_p3 = pnand %p889_p2, %p883_p13 }
  0xed   : > { %v410_v13 = vpop.f32.mrb[0].mxu0 }
  0xee   : > { %v411_v14 = vadd.f32 %v763_v12, %v410_v13  ;;  %v798_v15 = vpop.f32.mrb[1].mxu0 }
  0xf0   : > { %v415_v16 = vmul.f32 0.70710677, %v411_v14  ;;  %v414_v18 = vmul.f32 0.5, %v411_v14 }
  0xf2   : > { %872 = verf.f32 %v415_v16 }
  0xfc   : > { %v873_v17 = vpop.eup %872 }
  0xfd   : > { %v417_v19 = vadd.f32 1.0, %v873_v17 }
  0xff   : > { %v418_v20 = vmul.f32 %v417_v19, %v414_v18 }
 0x101   : > { %804 = vmatmul.mubr.msk.f32.vlgmr.msra.gmra.mrb[0].mxu1 %vm428_vm2, %v418_v20 }
 0x102   : > { %808 = vmatprep.mubr.msk.f32.mxu1 %vm945_vm0, %v946_v6  ;;  %807 = vmatpush3.msra.mxu1 %v507_v21 }
 0x1d4   : > { %v498_v23 = vpop.f32.mrb[0].mxu1 }
 0x1d5   : > { %v499_v24 = vadd.f32 %v765_v22, %v498_v23  ;;  %v805_v25 = vpop.f32.mrb[1].mxu1 }
 0x1d7   : > { %v503_v26 = vmul.f32 0.70710677, %v499_v24  ;;  %v502_v28 = vmul.f32 0.5, %v499_v24 }
 0x1d9   : > { %874 = verf.f32 %v503_v26 }
 0x1e3   : > { %v875_v27 = vpop.eup %874 }
 0x1e4   : > { %v505_v29 = vadd.f32 1.0, %v875_v27 }
 0x1e6   : > { %v506_v30 = vmul.f32 %v505_v29, %v502_v28 }
 0x1e8   : > { %809 = vmatmul.mubr.msk.f32.vlgmr.msra.gmra.mrb[2].mxu1 %vm515_vm3, %v506_v30 }
 0x2bb   : > { %v585_v35 = vpop.f32.mrb[2].mxu1 }
 0x2bc   : > { %v586_v36 = vadd.f32 %v767_v34, %v585_v35  ;;  %v810_v37 = vpop.f32.mrb[3].mxu1 }
 0x2be   : > { %v590_v38 = vmul.f32 0.70710677, %v586_v36  ;;  %v589_v40 = vmul.f32 0.5, %v586_v36 }
 0x2c0   : > { %876 = verf.f32 %v590_v38 }
 0x2ca   : > { %v877_v39 = vpop.eup %876 }
 0x2cb   : > { %v592_v41 = vadd.f32 1.0, %v877_v39 }
 0x2cd   : > { %v593_v42 = vmul.f32 %v592_v41, %v589_v40 }
 0x2cf   : > { %v594_v43 = vadd.f32 %v593_v42, %v418_v20 }
 0x2d1   : > { %816 = vmatmul.mubr.msk.f32.vlgmr.msra.gmra.mrb[2].mxu0 %vm428_vm2, %v594_v43 }
 0x3a4   : > { %v673_v45 = vpop.f32.mrb[2].mxu0 }
 0x3a5   : > { %v674_v46 = vadd.f32 %v769_v44, %v673_v45  ;;  %v817_v47 = vpop.f32.mrb[3].mxu0 }
 0x3a7   : > { %v678_v48 = vmul.f32 0.70710677, %v674_v46  ;;  %v677_v50 = vmul.f32 0.5, %v674_v46 }
 0x3a9   : > { %878 = verf.f32 %v678_v48 }
 0x3b3   : > { %v879_v49 = vpop.eup %878 }
 0x3b4   : > { %v680_v51 = vadd.f32 1.0, %v879_v49 }
 0x3b6   : > { %v681_v52 = vmul.f32 %v680_v51, %v677_v50 }
 0x3b8   : > { %v682_v53 = vadd.f32 %v681_v52, %v1065_v8 }
 0x3ba   : > { %683 = vst.msk [vmem:[%s323_s16] sm:$0xff] %vm340_vm1, %v682_v53 }
 0x3bb   : > { %893 = shalt.err (!%p890_p3)
}
 0x3bc   : > { %s894_s28 = scalar_lea.hbm %s1106_s23, 128  ;;  %s898_s16 = scalar_lea.hbm %s1158_s9, 256 }
 0x3bd   : > { %p895_p4 = scmp.ne.s32.totalorder %s1106_s23, %s894_s28  ;;  %p899_p9 = scmp.lt.u32.totalorder %s1106_s23, %s1158_s9 }
 0x3be   : > { %p900_p10 = scmp.lt.u32.totalorder %s898_s16, %s894_s28  ;;  %p902_p12 = scmp.lt.u32.totalorder %s894_s28, %s1106_s23 }
 0x3bf   : > { %p896_p7 = pnand %p895_p4, %p1036_p5 }
 0x3c0   : > { %p901_p11 = por %p900_p10, %p899_p9 }
 0x3c1   : > { %p897_p8 = pneg %p896_p7 }
 0x3c2   : > { %p903_p13 = por %p902_p12, %p901_p11 }
 0x3c4   : > { %p904_p0 = pnand %p903_p13, %p897_p8 }
 0x3c6   : > { %907 = shalt.err (!%p904_p0)
}
 0x3c7   : > { %830 = dma.vmem_to_hbm [thread:$0]  (%p1036_p5), %s1108_s17, 128, %s1106_s23, %s685_s24  }
 0x3c8 PF: > { %p836_p1 = scmp.ge.s32.totalorder %s942_s12, 2  ;;  %s710_s25 = sand.u32 1, %s930_s30  }
 0x3c9   : > { %s711_s13 = scalar_lea.sflag [#allocation3], %s710_s25 }
 0x3ca   : > { %p833_p2 = pnand %p836_p1, %p1040_p6 }
 0x3cc   : > { %925 = dma.done.wait (!%p833_p2), %s711_s13, 128  }
 0x3cd   : > { %927 = vsyncadd (!%p833_p2), %s711_s13, 4294967168  ;;  %p19_p3 = scmp.ge.s32.totalorder %s1023_s15, 4   ;;  %s1161_s30 = smov %s934_s10 }
 0x3ce   : > { %s1162_s10 = smov %s938_s11  ;;  %s1163_s11 = smov %s1034_s18 }
 0x3cf   : > { %s1164_s12 = smov %s1023_s15  ;;  %21 = sbr.rel (!%p19_p3) target bundleno = 3 (0x3), region = 91 }
 0x3d6   :  { %716 = vsyncpa [#allocation3], 1 }
 0x3d7   :  { %718 = vsyncpa [#allocation3 + $0x1], 1 }

</bundles_post_ra>
